<compile_context>
chip_gen: v6e
topology: v6e:2x2x1
jax: 0.10.0
libtpu: 0.0.40
codegen_flags: <defaults>
</compile_context>

<pallas_src>
import jax
import jax.numpy as jnp
from jax.experimental import pallas as pl
from jax.experimental.pallas import tpu as pltpu


def _round_up(x, m):
    return ((x + m - 1) // m) * m


def _cdiv(a, b):
    return -(-a // b)


def critic_kernel(s_ref, a_ref, w1s_ref, w1a_ref, b1_ref,
                  w2_ref, b2_ref, w3_ref, b3_ref, q_ref):
    # ---- Layer 1: bf16 MXU dot for the 8-wide state slab, f32 accumulate. ---
    h1 = jnp.dot(s_ref[...].astype(jnp.bfloat16), w1s_ref[...],
                 preferred_element_type=jnp.float32) + b1_ref[...]
    # Action slab (n_actions tiny): fold in as rank-1 VPU broadcast-FMAs
    # instead of pushing a K=2 operand through the MXU.  Stays f32 on the VPU.
    act = a_ref[...]                                    # [tm, n_act] f32
    for j in range(act.shape[1]):                       # static unroll (n_act)
        h1 = h1 + act[:, j:j + 1] * w1a_ref[j:j + 1, :]
    h1 = jnp.maximum(h1, 0.0)                           # ReLU (f32, VPU)

    # ---- Layer 2: 256x256 bf16 MXU dot, f32 bias + ReLU. -------------------
    h2 = jnp.dot(h1.astype(jnp.bfloat16), w2_ref[...],
                 preferred_element_type=jnp.float32) + b2_ref[...]
    h2 = jnp.maximum(h2, 0.0)                           # [tm, l2] f32

    # ---- Head (fan_out = 1), produced lane-major: -------------------------
    # [1, l2] @ [tm, l2]^T -> [1, tm]  (trans_b matmul, same as q @ k.T).
    # b3 is a scalar read from SMEM.  Output is a dense 128-aligned lane row,
    # so HBM writeback is exactly 4 bytes per batch element.
    q = jnp.dot(w3_ref[...], h2.T,
                preferred_element_type=jnp.float32) + b3_ref[0]   # [1, tm]
    q_ref[...] = q.astype(q_ref.dtype)


def critic_forward(state, action, params, tile_m=1024):
    """state: [B, input_dims], action: [B, n_actions] -> q: [B, 1]"""
    w1s, w1a, b1, w2, b2, w3, b3 = params
    B, in_dims = state.shape
    n_act = action.shape[1]
    l1 = w1s.shape[1]
    l2 = w2.shape[1]

    # --- Batch tiling: 128-aligned tiles so the lane-major (1, tm) output
    # block and the trans_b head matmul stay tile-aligned; use >= 2 grid steps
    # when the batch allows so "parallel" can shard across v7x's 2 TCs.
    lane = 128
    b_ceil = _round_up(max(B, 1), lane)
    tile_m = max(lane, _round_up(tile_m, lane))
    n_tiles = _cdiv(b_ceil, tile_m)
    if n_tiles == 1 and b_ceil >= 2 * lane:
        n_tiles = 2
    tm = _round_up(_cdiv(b_ceil, n_tiles), lane)
    b_pad = n_tiles * tm
    if b_pad != B:
        state = jnp.pad(state, ((0, b_pad - B), (0, 0)))
        action = jnp.pad(action, ((0, b_pad - B), (0, 0)))

    resident = lambda i: (0, 0)   # weights/biases: same block every grid step

    flops = 2 * b_pad * (in_dims * l1 + n_act * l1 + l1 * l2 + l2)
    bytes_accessed = (b_pad * (in_dims + n_act) * 4                 # inputs
                      + int(w1s.size) * 2 + int(w2.size) * 2        # bf16 weights
                      + (int(w1a.size) + int(b1.size) + int(b2.size)
                         + int(w3.size) + 1) * 4                    # f32 params
                      + b_pad * 4)                                  # q row out
    cost = pl.CostEstimate(flops=flops, transcendentals=0,
                           bytes_accessed=bytes_accessed)

    q_row = pl.pallas_call(
        critic_kernel,
        out_shape=jax.ShapeDtypeStruct((1, b_pad), jnp.float32),
        grid_spec=pltpu.PrefetchScalarGridSpec(
            num_scalar_prefetch=0,
            grid=(n_tiles,),
            in_specs=[
                pl.BlockSpec((tm, in_dims), lambda i: (i, 0)),      # state tile
                pl.BlockSpec((tm, n_act), lambda i: (i, 0)),        # action tile
                pl.BlockSpec((in_dims, l1), resident),              # w1 state slab (bf16)
                pl.BlockSpec((n_act, l1), resident),                # w1 action rows (f32)
                pl.BlockSpec((1, l1), resident),                    # b1
                pl.BlockSpec((l1, l2), resident),                   # w2 (bf16)
                pl.BlockSpec((1, l2), resident),                    # b2
                pl.BlockSpec((1, l2), resident),                    # w3 row (f32)
                pl.BlockSpec(memory_space=pltpu.MemorySpace.SMEM),  # b3 scalar
            ],
            out_specs=pl.BlockSpec((1, tm), lambda i: (0, i)),      # lane-major q
        ),
        compiler_params=pltpu.CompilerParams(
            dimension_semantics=("parallel",),   # shard batch tiles across TCs
        ),
        cost_estimate=cost,
    )(state, action, w1s, w1a, b1, w2, b2, w3, b3)

    return q_row[:, :B].reshape(B, 1)


def init_critic_params(key, input_dims, n_actions, l1=256, l2=256):
    """Deterministic init mimicking torch.nn.Linear (uniform +/- 1/sqrt(fan_in))."""
    def uniform(k, shape, fan_in):
        bound = 1.0 / jnp.sqrt(float(fan_in))
        return jax.random.uniform(k, shape, jnp.float32, -bound, bound)

    k1w, k1b, k2w, k2b, k3w, k3b = jax.random.split(key, 6)
    fan1 = input_dims + n_actions
    w1 = uniform(k1w, (fan1, l1), fan1)
    b1 = uniform(k1b, (1, l1), fan1)
    w2 = uniform(k2w, (l1, l2), l1)
    b2 = uniform(k2b, (1, l2), l1)
    w3 = uniform(k3w, (1, l2), l2)     # stored as a row -> trans_b head matmul
    b3 = uniform(k3b, (1,), l2)        # scalar, passed via SMEM
    # Split w1 into state / action slabs (fused concat); MXU operands bf16,
    # VPU-path (action rows) and head stay f32.
    w1s = w1[:input_dims].astype(jnp.bfloat16)
    w1a = w1[input_dims:]
    w2 = w2.astype(jnp.bfloat16)
    return (w1s, w1a, b1, w2, b2, w3, b3)

# TODO(synk): optimizer / save_checkpoint / load_checkpoint from the PyTorch
# module are training/IO-side and not part of the forward pass.


if __name__ == "__main__":
    key = jax.random.PRNGKey(0)

    # Small shapes consistent with the module: input_dims=(8,), actions_num=2.
    batch = 8
    input_dims = 8
    n_actions = 2
    layer1_size = 256
    layer2_size = 256

    k_params, k_state, k_action = jax.random.split(key, 3)
    params = init_critic_params(k_params, input_dims, n_actions,
                                layer1_size, layer2_size)

    state = jax.random.normal(k_state, (batch, input_dims), jnp.float32)
    action = jax.random.normal(k_action, (batch, n_actions), jnp.float32)

    q = critic_forward(state, action, params)
    jax.block_until_ready(q)

    # Cross-check against a pure-JAX f32 reference of the same forward pass
    # (bf16-rounded weights upcast; kernel additionally rounds activations to
    # bf16 for the MXU, hence the relaxed tolerance).
    w1s, w1a, b1, w2, b2, w3, b3 = params
    x = jnp.concatenate([state, action], axis=1)
    w1 = jnp.concatenate([w1s.astype(jnp.float32), w1a], axis=0)
    ref = jnp.maximum(x @ w1 + b1, 0.0)
    ref = jnp.maximum(ref @ w2.astype(jnp.float32) + b2, 0.0)
    ref = ref @ w3.T + b3[0]

    assert q.shape == (batch, 1)
    assert jnp.allclose(q, ref, atol=1e-2, rtol=1e-2)

    print("KERNEL_OK")
</pallas_src>

<mosaic_0001>
module attributes {stable_mosaic.version = 11 : i64} {
  func.func @critic_kernel(%arg0: i32, %arg1: memref<128x8xf32, #tpu.memory_space<vmem>>, %arg2: memref<128x2xf32, #tpu.memory_space<vmem>>, %arg3: memref<8x256xbf16, #tpu.memory_space<vmem>>, %arg4: memref<2x256xf32, #tpu.memory_space<vmem>>, %arg5: memref<1x256xf32, #tpu.memory_space<vmem>>, %arg6: memref<256x256xbf16, #tpu.memory_space<vmem>>, %arg7: memref<1x256xf32, #tpu.memory_space<vmem>>, %arg8: memref<1x256xf32, #tpu.memory_space<vmem>>, %arg9: memref<1xf32, #tpu.memory_space<smem>>, %arg10: memref<1x128xf32, #tpu.memory_space<vmem>>) attributes {dimension_semantics = [#tpu.dimension_semantics<parallel>], iteration_bounds = array<i64: 1>, scalar_prefetch = 0 : i64, scratch_operands = 0 : i64, tpu.core_type = #tpu.core_type<tc>, window_params = [{transform_indices = @transform_0, window_bounds = array<i64: 128, 8>}, {transform_indices = @transform_1, window_bounds = array<i64: 128, 2>}, {pipeline_mode = #tpu.pipeline_mode<synchronous>, transform_indices = @transform_2, window_bounds = array<i64: 8, 256>}, {pipeline_mode = #tpu.pipeline_mode<synchronous>, transform_indices = @transform_3, window_bounds = array<i64: 2, 256>}, {pipeline_mode = #tpu.pipeline_mode<synchronous>, transform_indices = @transform_4, window_bounds = array<i64: 1, 256>}, {pipeline_mode = #tpu.pipeline_mode<synchronous>, transform_indices = @transform_5, window_bounds = array<i64: 256, 256>}, {pipeline_mode = #tpu.pipeline_mode<synchronous>, transform_indices = @transform_6, window_bounds = array<i64: 1, 256>}, {pipeline_mode = #tpu.pipeline_mode<synchronous>, transform_indices = @transform_7, window_bounds = array<i64: 1, 256>}, {transform_indices = @transform_8, window_bounds = array<i64: 1>}, {transform_indices = @transform_9, window_bounds = array<i64: 1, 128>}]} {
    %c0 = arith.constant 0 : index
    %c0_0 = arith.constant 0 : index
    %0 = vector.load %arg1[%c0, %c0_0] : memref<128x8xf32, #tpu.memory_space<vmem>>, vector<128x8xf32>
    %1 = arith.truncf %0 : vector<128x8xf32> to vector<128x8xbf16>
    %c0_1 = arith.constant 0 : index
    %c0_2 = arith.constant 0 : index
    %2 = vector.load %arg3[%c0_1, %c0_2] : memref<8x256xbf16, #tpu.memory_space<vmem>>, vector<8x256xbf16>
    %cst = arith.constant dense<0.000000e+00> : vector<128x256xf32>
    %3 = tpu.matmul %1, %2, %cst {dimension_numbers = #tpu.dot_dimension_numbers<[1], [0], [0], [1], [0, 0, 1, 1], [], []>} : vector<128x8xbf16>, vector<8x256xbf16>, vector<128x256xf32> -> vector<128x256xf32>
    %c0_3 = arith.constant 0 : index
    %c0_4 = arith.constant 0 : index
    %4 = vector.load %arg5[%c0_3, %c0_4] : memref<1x256xf32, #tpu.memory_space<vmem>>, vector<1x256xf32>
    %5 = vector.broadcast %4 : vector<1x256xf32> to vector<128x256xf32>
    %6 = arith.addf %3, %5 : vector<128x256xf32>
    %c0_5 = arith.constant 0 : index
    %c0_6 = arith.constant 0 : index
    %7 = vector.load %arg2[%c0_5, %c0_6] : memref<128x2xf32, #tpu.memory_space<vmem>>, vector<128x2xf32>
    %8 = vector.extract_strided_slice %7 {offsets = [0, 0], sizes = [128, 1], strides = [1, 1]} : vector<128x2xf32> to vector<128x1xf32>
    %c0_7 = arith.constant 0 : index
    %c0_8 = arith.constant 0 : index
    %9 = vector.load %arg4[%c0_7, %c0_8] : memref<2x256xf32, #tpu.memory_space<vmem>>, vector<1x256xf32>
    %10 = vector.broadcast %8 : vector<128x1xf32> to vector<128x256xf32>
    %11 = vector.broadcast %9 : vector<1x256xf32> to vector<128x256xf32>
    %12 = arith.mulf %10, %11 : vector<128x256xf32>
    %13 = arith.addf %6, %12 : vector<128x256xf32>
    %14 = vector.extract_strided_slice %7 {offsets = [0, 1], sizes = [128, 1], strides = [1, 1]} : vector<128x2xf32> to vector<128x1xf32>
    %c1 = arith.constant 1 : index
    %c0_9 = arith.constant 0 : index
    %15 = vector.load %arg4[%c1, %c0_9] : memref<2x256xf32, #tpu.memory_space<vmem>>, vector<1x256xf32>
    %16 = vector.broadcast %14 : vector<128x1xf32> to vector<128x256xf32>
    %17 = vector.broadcast %15 : vector<1x256xf32> to vector<128x256xf32>
    %18 = arith.mulf %16, %17 : vector<128x256xf32>
    %19 = arith.addf %13, %18 : vector<128x256xf32>
    %cst_10 = arith.constant 0.000000e+00 : f32
    %20 = vector.broadcast %cst_10 : f32 to vector<128x256xf32>
    %21 = arith.maximumf %19, %20 : vector<128x256xf32>
    %22 = arith.truncf %21 : vector<128x256xf32> to vector<128x256xbf16>
    %c0_11 = arith.constant 0 : index
    %c0_12 = arith.constant 0 : index
    %23 = vector.load %arg6[%c0_11, %c0_12] : memref<256x256xbf16, #tpu.memory_space<vmem>>, vector<256x256xbf16>
    %cst_13 = arith.constant dense<0.000000e+00> : vector<128x256xf32>
    %24 = tpu.matmul %22, %23, %cst_13 {dimension_numbers = #tpu.dot_dimension_numbers<[1], [0], [0], [1], [0, 0, 1, 1], [], []>} : vector<128x256xbf16>, vector<256x256xbf16>, vector<128x256xf32> -> vector<128x256xf32>
    %c0_14 = arith.constant 0 : index
    %c0_15 = arith.constant 0 : index
    %25 = vector.load %arg7[%c0_14, %c0_15] : memref<1x256xf32, #tpu.memory_space<vmem>>, vector<1x256xf32>
    %26 = vector.broadcast %25 : vector<1x256xf32> to vector<128x256xf32>
    %27 = arith.addf %24, %26 : vector<128x256xf32>
    %cst_16 = arith.constant 0.000000e+00 : f32
    %28 = vector.broadcast %cst_16 : f32 to vector<128x256xf32>
    %29 = arith.maximumf %27, %28 : vector<128x256xf32>
    %c0_17 = arith.constant 0 : index
    %c0_18 = arith.constant 0 : index
    %30 = vector.load %arg8[%c0_17, %c0_18] : memref<1x256xf32, #tpu.memory_space<vmem>>, vector<1x256xf32>
    %31 = tpu.transpose %29, [1, 0] : vector<128x256xf32> -> vector<256x128xf32>
    %cst_19 = arith.constant dense<0.000000e+00> : vector<1x128xf32>
    %32 = tpu.matmul %30, %31, %cst_19 {dimension_numbers = #tpu.dot_dimension_numbers<[1], [0], [0], [1], [0, 0, 1, 1], [], []>} : vector<1x256xf32>, vector<256x128xf32>, vector<1x128xf32> -> vector<1x128xf32>
    %c0_20 = arith.constant 0 : index
    %33 = memref.load %arg9[%c0_20] : memref<1xf32, #tpu.memory_space<smem>>
    %34 = vector.broadcast %33 : f32 to vector<1x128xf32>
    %35 = arith.addf %32, %34 : vector<1x128xf32>
    %c0_21 = arith.constant 0 : index
    %c0_22 = arith.constant 0 : index
    %36 = vector.load %arg10[%c0_21, %c0_22] : memref<1x128xf32, #tpu.memory_space<vmem>>, vector<1x128xf32>
    tpu.vector_store %arg10[%c0_21, %c0_22], %35 {strides = array<i32>} : memref<1x128xf32, #tpu.memory_space<vmem>>, vector<1x128xf32>,
    return
  }
  func.func @transform_0(%arg0: i32) -> (i32, i32) {
    %c0_i32 = arith.constant 0 : i32
    %c0_i32_0 = arith.constant 0 : i32
    return %arg0, %c0_i32 : i32, i32
  }
  func.func @transform_1(%arg0: i32) -> (i32, i32) {
    %c0_i32 = arith.constant 0 : i32
    %c0_i32_0 = arith.constant 0 : i32
    return %arg0, %c0_i32 : i32, i32
  }
  func.func @transform_2(%arg0: i32) -> (i32, i32) {
    %c0_i32 = arith.constant 0 : i32
    %c0_i32_0 = arith.constant 0 : i32
    %c0_i32_1 = arith.constant 0 : i32
    return %c0_i32, %c0_i32_0 : i32, i32
  }
  func.func @transform_3(%arg0: i32) -> (i32, i32) {
    %c0_i32 = arith.constant 0 : i32
    %c0_i32_0 = arith.constant 0 : i32
    %c0_i32_1 = arith.constant 0 : i32
    return %c0_i32, %c0_i32_0 : i32, i32
  }
  func.func @transform_4(%arg0: i32) -> (i32, i32) {
    %c0_i32 = arith.constant 0 : i32
    %c0_i32_0 = arith.constant 0 : i32
    %c0_i32_1 = arith.constant 0 : i32
    return %c0_i32, %c0_i32_0 : i32, i32
  }
  func.func @transform_5(%arg0: i32) -> (i32, i32) {
    %c0_i32 = arith.constant 0 : i32
    %c0_i32_0 = arith.constant 0 : i32
    %c0_i32_1 = arith.constant 0 : i32
    return %c0_i32, %c0_i32_0 : i32, i32
  }
  func.func @transform_6(%arg0: i32) -> (i32, i32) {
    %c0_i32 = arith.constant 0 : i32
    %c0_i32_0 = arith.constant 0 : i32
    %c0_i32_1 = arith.constant 0 : i32
    return %c0_i32, %c0_i32_0 : i32, i32
  }
  func.func @transform_7(%arg0: i32) -> (i32, i32) {
    %c0_i32 = arith.constant 0 : i32
    %c0_i32_0 = arith.constant 0 : i32
    %c0_i32_1 = arith.constant 0 : i32
    return %c0_i32, %c0_i32_0 : i32, i32
  }
  func.func @transform_8(%arg0: i32) -> i32 {
    %c0_i32 = arith.constant 0 : i32
    %c0_i32_0 = arith.constant 0 : i32
    return %c0_i32 : i32
  }
  func.func @transform_9(%arg0: i32) -> (i32, i32) {
    %c0_i32 = arith.constant 0 : i32
    %c0_i32_0 = arith.constant 0 : i32
    return %c0_i32, %arg0 : i32, i32
  }
}

</mosaic_0001>

<bundles_post_ra>
// kernel: tpu_custom_call.1
= control target key start
LH: loop header
LB: loop body
LE: loop exit
PB: predicated region body
PF: predicated region fallthrough
CT: control target
= control target key end

     0   :  { %vm102_vm0 = vcmask 1043456   ;;  %v1171_v5 = vmov 0   ;;  %v1172_v6 = vmov 1   ;;  %vm77_vm1 = vcmask 64512   ;;  %s1735_s0 = inlined_call_operand.vmem [shape: f32[128,8], index: 0, kind: input, shape index: {}]   ;;  %s1736_s1 = inlined_call_operand.vmem [shape: f32[128,2], index: 1, kind: input, shape index: {}]   ;;  %s1737_s2 = inlined_call_operand.vmem [shape: bf16[8,256], index: 2, kind: input, shape index: {}]   ;;  %s1738_s3 = inlined_call_operand.vmem [shape: f32[2,256], index: 3, kind: input, shape index: {}]   ;;  %s1739_s4 = inlined_call_operand.vmem [shape: f32[1,256], index: 4, kind: input, shape index: {}]   ;;  %s1740_s5 = inlined_call_operand.vmem [shape: bf16[256,256], index: 5, kind: input, shape index: {}]   ;;  %s1741_s6 = inlined_call_operand.vmem [shape: f32[1,256], index: 6, kind: input, shape index: {}]   ;;  %s1742_s7 = inlined_call_operand.vmem [shape: f32[1,256], index: 7, kind: input, shape index: {}]   ;;  %s1743_s8 = inlined_call_operand.<no memory space> [shape: f32[1], index: 8, kind: input, shape index: {}]   ;;  %s1744_s9 = inlined_call_operand.hbm [shape: f32[1,128], index: 9, kind: output, shape index: {}]  }
   0x1   :  { %v59_v0 = vld [vmem:[%s1737_s2] sm:$0xff]  ;;  %v36_v2 = vld [vmem:[%s1735_s0 + $0x8] sm:$0xff]  ;;  %141 = vmatprep.mubr.bf16.mxu0 %v1171_v5  ;;  %1078 = vset.pattern.permute.xlu0 %v1171_v5  ;;  %v37_v11 = vld [vmem:[%s1735_s0 + $0x10] sm:$0xff] }
   0x2   :  { %v35_v1 = vld [vmem:[%s1735_s0] sm:$0xff]  ;;  %v1032_v3 = vcombine.high %v59_v0, %v59_v0  ;;  %v1031_v4 = vcombine.low %v59_v0, %v59_v0  ;;  %1079 = vset.pattern.permute.xlu1 %v1172_v6  ;;  %v223_v10 = vld [vmem:[%s1736_s1 + $0x8] sm:$0xff]  ;;  %v38_v12 = vld [vmem:[%s1735_s0 + $0x18] sm:$0xff] }
   0x3   :  { %v51_v8 = vpack.c.bf16 %v36_v2, %v35_v1  ;;  %v222_v9 = vld [vmem:[%s1736_s1] sm:$0xff]  ;;  %v225_v13 = vld [vmem:[%s1736_s1 + $0x18] sm:$0xff]  ;;  %v224_v14 = vld [vmem:[%s1736_s1 + $0x10] sm:$0xff]  ;;  %v52_v15 = vpack.c.bf16 %v38_v12, %v37_v11 }
   0x4   :  { %1033 = vmatprep.subr.msk.bf16.mxu0 %vm102_vm0, %v1032_v3  ;;  %v104_v7 = vsel %vm102_vm0, %v1031_v4, 0  ;;  %397 = vperm.xlu1 %1079, %v222_v9   ;;  %v1101_v16 = vld [vmem:[%s1740_s5 + $0x74] ss:$8 sps:$4 sm:$0xff]   ;;  %v1103_v17 = vld [vmem:[%s1740_s5 + $0x70] ss:$8 sps:$4 sm:$0xff]   ;;  %v39_v19 = vld [vmem:[%s1735_s0 + $0x20] sm:$0xff] }
   0x5   :  { %124 = vmatpush1.bf16.msra.mxu0 %v104_v7  ;;  %241 = vperm.xlu0 %1078, %v222_v9   ;;  %v1104_v18 = vld [vmem:[%s1740_s5 + $0x64] ss:$8 sps:$4 sm:$0xff]   ;;  %v1106_v22 = vld [vmem:[%s1740_s5 + $0x60] ss:$8 sps:$4 sm:$0xff]   ;;  %v1107_v23 = vld [vmem:[%s1740_s5 + $0x54] ss:$8 sps:$4 sm:$0xff]  }
   0x6   :  { %v40_v20 = vld [vmem:[%s1735_s0 + $0x28] sm:$0xff]  ;;  %787 = vmatprep.subr.bf16.mxu1 %v1101_v16  ;;  %v226_v25 = vld [vmem:[%s1736_s1 + $0x20] sm:$0xff]  ;;  %v1109_v26 = vld [vmem:[%s1740_s5 + $0x50] ss:$8 sps:$4 sm:$0xff]  }
   0x7   :  { %v227_v21 = vld [vmem:[%s1736_s1 + $0x28] sm:$0xff]  ;;  %788 = vmatpush1.bf16.msra.mxu1 %v1103_v17  ;;  %v53_v24 = vpack.c.bf16 %v40_v20, %v39_v19  ;;  %v228_v28 = vld [vmem:[%s1736_s1 + $0x30] sm:$0xff]  ;;  %v42_v30 = vld [vmem:[%s1735_s0 + $0x38] sm:$0xff] }
   0x8   :  { %1034 = vmatmul.mubr.msk.bf16.vlgmr.msra.gmra.mxu0 %vm77_vm1, %v51_v8  ;;  %401 = vperm.xlu1 %1079, %v223_v10   ;;  %v1110_v27 = vld [vmem:[%s1740_s5 + $0x44] ss:$8 sps:$4 sm:$0xff]   ;;  %v41_v29 = vld [vmem:[%s1735_s0 + $0x30] sm:$0xff]  ;;  %v1112_v31 = vld [vmem:[%s1740_s5 + $0x40] ss:$8 sps:$4 sm:$0xff]  }
   0x9   :  { %151 = vmatprep.mubr.bf16.mxu0 %v1171_v5  ;;  %246 = vperm.xlu0 %1078, %v223_v10   ;;  %v1113_v32 = vld [vmem:[%s1740_s5 + $0x34] ss:$8 sps:$4 sm:$0xff]   ;;  %v54_v33 = vpack.c.bf16 %v42_v30, %v41_v29  ;;  %v1115_v34 = vld [vmem:[%s1740_s5 + $0x30] ss:$8 sps:$4 sm:$0xff]   ;;  %v1116_v35 = vld [vmem:[%s1740_s5 + $0x24] ss:$8 sps:$4 sm:$0xff]  }
   0xa   :  { %789 = vmatprep.subr.bf16.mxu1 %v1104_v18 }
   0xb   :  { %790 = vmatpush1.bf16.msra.mxu1 %v1106_v22 }
   0xc   :  { %1080 = vset.pattern.permute.xlu1 %v1171_v5  ;;  %791 = vmatprep.subr.bf16.mxu1 %v1107_v23 }
   0xd   :  { %251 = vperm.xlu0 %1078, %v224_v14   ;;  %256 = vperm.xlu1 %1080, %v225_v13  }
   0xf   :  { %792 = vmatpush1.bf16.msra.mxu1 %v1109_v26 }
  0x10   :  { %1035 = vmatmul.mubr.msk.bf16.gmra.mxu0 %vm77_vm1, %v52_v15  ;;  %793 = vmatprep.subr.bf16.mxu1 %v1110_v27 }
  0x11   :  { %161 = vmatprep.mubr.bf16.mxu0 %v1171_v5  ;;  %266 = vperm.xlu0 %1078, %v227_v21  }
  0x12   :  { %1081 = vset.pattern.permute.xlu1 %v1172_v6 }
  0x13   :  { %409 = vperm.xlu1 %1081, %v225_v13   ;;  %794 = vmatpush1.bf16.msra.mxu1 %v1112_v31 }
  0x14   :  { %795 = vmatprep.subr.bf16.mxu1 %v1113_v32 }
  0x15   :  { %1083 = vset.pattern.permute.xlu0 %v1172_v6 }
  0x16   :  { %405 = vperm.xlu0 %1083, %v224_v14  }
  0x17   :  { %1082 = vset.pattern.permute.xlu1 %v1171_v5 }
  0x18   :  { %1036 = vmatmul.mubr.msk.bf16.gmra.mxu0 %vm77_vm1, %v53_v24  ;;  %261 = vperm.xlu1 %1082, %v226_v25  }
  0x19   :  { %171 = vmatprep.mubr.bf16.mxu0 %v1171_v5 }
  0x1a   :  { %421 = vperm.xlu0 %1083, %v228_v28  }
  0x1c   :  { %1084 = vset.pattern.permute.xlu1 %v1172_v6 }
  0x1d   :  { %413 = vperm.xlu1 %1084, %v226_v25  }
  0x1e   :  { %1086 = vset.pattern.permute.xlu0 %v1171_v5 }
  0x1f   :  { %15 = vsyncpa [#allocation4], 0  ;;  %271 = vperm.xlu0 %1086, %v228_v28   ;;  %v43_v36 = vld [vmem:[%s1735_s0 + $0x40] sm:$0xff]  ;;  %v44_v37 = vld [vmem:[%s1735_s0 + $0x48] sm:$0xff]  ;;  %796 = vmatpush1.bf16.msra.mxu1 %v1115_v34  ;;  %v62_v22 = vlaneseq  ;;  %s1173_s11 = smov [#allocation3]  }
  0x20   :  { %1037 = vmatmul.mubr.msk.bf16.gmra.mxu0 %vm77_vm1, %v54_v33  ;;  %v231_v38 = vld [vmem:[%s1736_s1 + $0x48] sm:$0xff]  ;;  %797 = vmatprep.subr.bf16.mxu1 %v1116_v35  ;;  %v1119_v40 = vld [vmem:[%s1740_s5 + $0x14] ss:$8 sps:$4 sm:$0xff]   ;;  %v55_v41 = vpack.c.bf16 %v44_v37, %v43_v36  ;;  %v1121_v44 = vld [vmem:[%s1740_s5 + $0x10] ss:$8 sps:$4 sm:$0xff]   ;;  %s1023_s12 = sshll.u32 %s1173_s11, 4  ;;  %s1024_s12 = int_to_ptr.vmem [resolvable:$true] %s1023_s12 }
  0x21   :  { %181 = vmatprep.mubr.bf16.mxu0 %v1171_v5  ;;  %417 = vperm.xlu1 %1084, %v227_v21   ;;  %v1118_v39 = vld [vmem:[%s1740_s5 + $0x20] ss:$8 sps:$4 sm:$0xff]   ;;  %v229_v42 = vld [vmem:[%s1736_s1 + $0x38] sm:$0xff]  ;;  %v232_v43 = vld [vmem:[%s1736_s1 + $0x50] sm:$0xff]  ;;  %s1149_s13 = scalar_lea.vmem %s1024_s12, 16  ;;  %s1153_s14 = scalar_lea.vmem %s1024_s12, 32 }
  0x22   :  { %v1122_v45 = vld [vmem:[%s1740_s5 + $0x4] ss:$8 sps:$4 sm:$0xff]   ;;  %v45_v46 = vld [vmem:[%s1735_s0 + $0x50] sm:$0xff]  ;;  %v46_v47 = vld [vmem:[%s1735_s0 + $0x58] sm:$0xff]  ;;  %p1150_p0 = scmp.ne.s32.totalorder %s1024_s12, %s1149_s13  ;;  %p1154_p1 = scmp.lt.s32.totalorder %s1024_s12, %s1024_s12 }
  0x23   :  { %286 = vperm.xlu0 %1086, %v231_v38   ;;  %798 = vmatpush1.bf16.msra.mxu1 %v1118_v39  ;;  %v1124_v48 = vld [vmem:[%s1740_s5] ss:$8 sps:$4 sm:$0xff]   ;;  %v1125_v49 = vld [vmem:[%s1740_s5 + $0xf4] ss:$8 sps:$4 sm:$0xff]   ;;  %v56_v50 = vpack.c.bf16 %v46_v47, %v45_v46  ;;  %v1127_v52 = vld [vmem:[%s1740_s5 + $0xf0] ss:$8 sps:$4 sm:$0xff]   ;;  %p1155_p2 = scmp.lt.s32.totalorder %s1153_s14, %s1149_s13 }
  0x24   :  { %799 = vmatprep.subr.bf16.mxu1 %v1119_v40  ;;  %v230_v51 = vld [vmem:[%s1736_s1 + $0x40] sm:$0xff]  ;;  %v235_v54 = vld [vmem:[%s1736_s1 + $0x68] sm:$0xff]  ;;  %v1131_v58 = vld [vmem:[%s1740_s5 + $0xd4] ss:$8 sps:$4 sm:$0xff]  }
  0x25   :  { %1085 = vset.pattern.permute.xlu1 %v1171_v5  ;;  %v1128_v53 = vld [vmem:[%s1740_s5 + $0xe4] ss:$8 sps:$4 sm:$0xff]   ;;  %v1130_v57 = vld [vmem:[%s1740_s5 + $0xe0] ss:$8 sps:$4 sm:$0xff]   ;;  %v236_v60 = vld [vmem:[%s1736_s1 + $0x70] sm:$0xff]  ;;  %p1156_p3 = por %p1155_p2, %p1154_p1 }
  0x26   :  { %276 = vperm.xlu1 %1085, %v229_v42   ;;  %v47_v55 = vld [vmem:[%s1735_s0 + $0x60] sm:$0xff]  ;;  %v48_v56 = vld [vmem:[%s1735_s0 + $0x68] sm:$0xff]  ;;  %v1133_v61 = vld [vmem:[%s1740_s5 + $0xd0] ss:$8 sps:$4 sm:$0xff]  }
  0x27   :  { %291 = vperm.xlu0 %1086, %v232_v43   ;;  %800 = vmatpush1.bf16.msra.mxu1 %v1121_v44  ;;  %v57_v59 = vpack.c.bf16 %v48_v56, %v47_v55  ;;  %v1134_v62 = vld [vmem:[%s1740_s5 + $0xc4] ss:$8 sps:$4 sm:$0xff]   ;;  %v49_v63 = vld [vmem:[%s1735_s0 + $0x70] sm:$0xff]  ;;  %v50_v0 = vld [vmem:[%s1735_s0 + $0x78] sm:$0xff]  ;;  %p1157_p4 = pnand %p1156_p3, %p1150_p0 }
  0x28   :  { %1038 = vmatmul.mubr.msk.bf16.gmra.mxu0 %vm77_vm1, %v55_v41  ;;  %801 = vmatprep.subr.bf16.mxu1 %v1122_v45  ;;  %v1136_v1 = vld [vmem:[%s1740_s5 + $0xc0] ss:$8 sps:$4 sm:$0xff]   ;;  %v58_v2 = vpack.c.bf16 %v50_v0, %v49_v63  ;;  %v233_v3 = vld [vmem:[%s1736_s1 + $0x58] sm:$0xff]  ;;  %v1140_v9 = vld [vmem:[%s1740_s5 + $0xa4] ss:$8 sps:$4 sm:$0xff]  }
  0x29   :  { %191 = vmatprep.mubr.bf16.mxu0 %v1171_v5  ;;  %v234_v4 = vld [vmem:[%s1736_s1 + $0x60] sm:$0xff]  ;;  %v1137_v7 = vld [vmem:[%s1740_s5 + $0xb4] ss:$8 sps:$4 sm:$0xff]   ;;  %v1139_v8 = vld [vmem:[%s1740_s5 + $0xb0] ss:$8 sps:$4 sm:$0xff]  }
  0x2a   :  { %1087 = vset.pattern.permute.xlu1 %v1172_v6  ;;  %v1142_v10 = vld [vmem:[%s1740_s5 + $0xa0] ss:$8 sps:$4 sm:$0xff]   ;;  %v1143_v11 = vld [vmem:[%s1740_s5 + $0x94] ss:$8 sps:$4 sm:$0xff]   ;;  %v1145_v12 = vld [vmem:[%s1740_s5 + $0x90] ss:$8 sps:$4 sm:$0xff]  }
  0x2b   :  { %425 = vperm.xlu1 %1087, %v229_v42   ;;  %1091 = vset.pattern.permute.xlu0 %v1172_v6  ;;  %v237_v13 = vld [vmem:[%s1736_s1 + $0x78] sm:$0xff]  ;;  %v1146_v14 = vld [vmem:[%s1740_s5 + $0x84] ss:$8 sps:$4 sm:$0xff]   ;;  %v1148_v15 = vld [vmem:[%s1740_s5 + $0x80] ss:$8 sps:$4 sm:$0xff]  }
  0x2c   :  { %437 = vperm.xlu0 %1091, %v232_v43   ;;  %802 = vmatpush1.bf16.msra.mxu1 %v1124_v48  ;;  %v238_v29 = vld [vmem:[%s1738_s3] ss:$2 sm:$0x3]  ;;  %v1042_v30 = vld [vmem:[%s1738_s3 + $0x1] ss:$2 sm:$0x3] }
  0x2d   :  { %803 = vmatprep.subr.bf16.mxu1 %v1125_v49 }
  0x2f   :  { %1088 = vset.pattern.permute.xlu1 %v1171_v5 }
  0x30   :  { %1039 = vmatmul.mubr.msk.bf16.gmra.mxu0 %vm77_vm1, %v56_v50  ;;  %281 = vperm.xlu1 %1088, %v230_v51  }
  0x31   :  { %201 = vmatprep.mubr.bf16.mxu0 %v1171_v5  ;;  %1094 = vset.pattern.permute.xlu0 %v1171_v5 }
  0x32   :  { %804 = vmatpush2.bf16.msra.mxu1 %v1127_v52  ;;  %306 = vperm.xlu0 %1094, %v235_v54  }
  0x33   :  { %805 = vmatprep.subr.bf16.mxu1 %v1128_v53 }
  0x34   :  { %1089 = vset.pattern.permute.xlu1 %v1172_v6 }
  0x35   :  { %429 = vperm.xlu1 %1089, %v230_v51  }
  0x36   :  { %806 = vmatpush2.bf16.msra.mxu1 %v1130_v57  ;;  %311 = vperm.xlu0 %1094, %v236_v60  }
  0x37   :  { %807 = vmatprep.subr.bf16.mxu1 %v1131_v58 }
  0x38   :  { %1040 = vmatmul.mubr.msk.bf16.gmra.mxu0 %vm77_vm1, %v57_v59 }
  0x39   :  { %211 = vmatprep.mubr.bf16.mxu0 %v1171_v5  ;;  %433 = vperm.xlu1 %1089, %v231_v38  }
  0x3a   :  { %808 = vmatpush2.bf16.msra.mxu1 %v1133_v61  ;;  %1097 = vset.pattern.permute.xlu0 %v1172_v6 }
  0x3b   :  { %809 = vmatprep.subr.bf16.mxu1 %v1134_v62  ;;  %453 = vperm.xlu0 %1097, %v236_v60  }
  0x3d   :  { %1090 = vset.pattern.permute.xlu1 %v1171_v5 }
  0x3e   :  { %810 = vmatpush2.bf16.msra.mxu1 %v1136_v1  ;;  %296 = vperm.xlu1 %1090, %v233_v3  }
  0x3f   :  { %811 = vmatprep.subr.bf16.mxu1 %v1137_v7 }
  0x40   :  { %1041 = vmatmul.mubr.msk.bf16.gmra.mxu0 %vm77_vm1, %v58_v2 }
  0x42   :  { %1092 = vset.pattern.permute.xlu1 %v1172_v6  ;;  %812 = vmatpush2.bf16.msra.mxu1 %v1139_v8 }
  0x43   :  { %441 = vperm.xlu1 %1092, %v233_v3   ;;  %813 = vmatprep.subr.bf16.mxu1 %v1140_v9 }
  0x46   :  { %814 = vmatpush2.bf16.msra.mxu1 %v1142_v10 }
  0x47   :  { %1093 = vset.pattern.permute.xlu1 %v1171_v5  ;;  %815 = vmatprep.subr.bf16.mxu1 %v1143_v11 }
  0x48   :  { %301 = vperm.xlu1 %1093, %v234_v4  }
  0x4a   :  { %816 = vmatpush2.bf16.msra.mxu1 %v1145_v12 }
  0x4b   :  { %817 = vmatprep.subr.bf16.mxu1 %v1146_v14 }
  0x4c   :  { %1095 = vset.pattern.permute.xlu1 %v1172_v6 }
  0x4d   :  { %445 = vperm.xlu1 %1095, %v234_v4  }
  0x4e   :  { %818 = vmatpush2.bf16.msra.mxu1 %v1148_v15 }
  0x51   :  { %449 = vperm.xlu1 %1095, %v235_v54  }
  0x55   :  { %1096 = vset.pattern.permute.xlu1 %v1171_v5  ;;  %v63_v5 = vshrl.u32 %v62_v22, 7 }
  0x56   :  { %316 = vperm.xlu1 %1096, %v237_v13  }
  0x57   :  { %v1469_v27 = vsub.s32 0, %v63_v5  ;;  %v1471_v28 = vsub.s32 1, %v63_v5 }
  0x59   :  { %v1486_v34 = vrot.slane %v238_v29, %v1469_v27  ;;  %v1491_v37 = vrot.slane %v1042_v30, %v1469_v27  ;;  %v1494_v38 = vrot.slane %v238_v29, %v1471_v28  ;;  %v1500_v43 = vrot.slane %v1042_v30, %v1471_v28 }
  0x5a   :  { %1098 = vset.pattern.permute.xlu1 %v1172_v6  ;;  %v60_v6 = vld [vmem:[%s1739_s4] sm:$0x3] }
  0x5b   :  { %457 = vperm.xlu1 %1098, %v237_v13   ;;  %v1480_v31 = vrot.slane %v60_v6, %v1469_v27  ;;  %v1483_v32 = vrot.slane %v60_v6, %v1471_v28 }
  0x7f   :  { %v398_v16 = vpop.permute.xlu1 %397 }
  0x80   :  { %v242_v23 = vpop.permute.xlu0 %241  ;;  %v472_v57 = vmul.f32 %v1500_v43, %v398_v16  ;;  %v471_v59 = vmul.f32 %v1491_v37, %v398_v16 }
  0x81   :  { %v330_v40 = vmul.f32 %v1486_v34, %v242_v23  ;;  %v331_v44 = vmul.f32 %v1494_v38, %v242_v23 }
  0x83   :  { %v402_v17 = vpop.permute.xlu1 %401 }
  0x84   :  { %v247_v25 = vpop.permute.xlu0 %246  ;;  %v473_v48 = vmul.f32 %v1491_v37, %v402_v17  ;;  %v474_v60 = vmul.f32 %v1500_v43, %v402_v17 }
  0x85   :  { %v332_v46 = vmul.f32 %v1486_v34, %v247_v25  ;;  %v333_v51 = vmul.f32 %v1494_v38, %v247_v25 }
  0x88   :  { %v257_v18 = vpop.permute.xlu1 %256  ;;  %v252_v35 = vpop.permute.xlu0 %251 }
  0x89   :  { %v336_v8 = vmul.f32 %v1486_v34, %v257_v18  ;;  %v337_v9 = vmul.f32 %v1494_v38, %v257_v18  ;;  %v334_v10 = vmul.f32 %v1486_v34, %v252_v35  ;;  %v335_v11 = vmul.f32 %v1494_v38, %v252_v35 }
  0x8c   :  { %v267_v52 = vpop.permute.xlu0 %266 }
  0x8e   :  { %v1456_v19 = vpop.permute.xlu1 %409 }
  0x8f   :  { %v477_v13 = vmul.f32 %v1491_v37, %v1456_v19 }
  0x91   :  { %v406_v3 = vpop.permute.xlu0 %405 }
  0x92   :  { %v475_v22 = vmul.f32 %v1491_v37, %v406_v3  ;;  %v476_v23 = vmul.f32 %v1500_v43, %v406_v3 }
  0x93   :  { %v1458_v20 = vpop.permute.xlu1 %261 }
  0x98   :  { %v1460_v21 = vpop.permute.xlu1 %413 }
  0x9c   :  { %v1462_v24 = vpop.permute.xlu1 %417 }
  0xa1   :  { %v1464_v26 = vpop.permute.xlu1 %276 }
  0xa6   :  { %v1488_v36 = vpop.permute.xlu1 %425 }
  0xab   :  { %v1508_v56 = vpop.permute.xlu1 %281 }
  0xb0   :  { %v1522_v17 = vpop.permute.xlu1 %429 }
  0xc8   :  { %v143_v33 = vpop.f32.mrf.mxu0 }
  0xc9   :  { %v144_v41 = vadd.f32 %v143_v33, %v1480_v31 }
  0xca   :  { %v145_v39 = vpop.f32.mrf.mxu0 }
  0xcb   :  { %v146_v42 = vadd.f32 %v145_v39, %v1483_v32  ;;  %v362_v53 = vadd.f32 %v330_v40, %v144_v41  ;;  %v478_v40 = vmul.f32 %v1500_v43, %v1456_v19  ;;  %v340_v19 = vmul.f32 %v1486_v34, %v267_v52 }
  0xcc   :  { %v147_v45 = vpop.f32.mrf.mxu0 }
  0xcd   :  { %v148_v47 = vadd.f32 %v147_v45, %v1480_v31  ;;  %v363_v49 = vadd.f32 %v331_v44, %v146_v42  ;;  %v503_v1 = vadd.f32 %v471_v59, %v362_v53  ;;  %v339_v53 = vmul.f32 %v1494_v38, %v1458_v20  ;;  %v422_v59 = vpop.permute.xlu0 %421 }
  0xce   :  { %v149_v50 = vpop.f32.mrf.mxu0 }
  0xcf   :  { %v364_v54 = vadd.f32 %v332_v46, %v148_v47  ;;  %v150_v55 = vadd.f32 %v149_v50, %v1483_v32  ;;  %v504_v0 = vadd.f32 %v472_v57, %v363_v49  ;;  %v535_v6 = vmax.f32 %v503_v1, 0.0 }
  0xd0   :  { %v153_v58 = vpop.f32.mrf.mxu0 }
  0xd1   :  { %v505_v61 = vadd.f32 %v473_v48, %v364_v54  ;;  %v365_v62 = vadd.f32 %v333_v51, %v150_v55  ;;  %v154_v2 = vadd.f32 %v153_v58, %v1480_v31  ;;  %v536_v25 = vmax.f32 %v504_v0, 0.0  ;;  %v1531_v51 = vpop.permute.xlu1 %433 }
  0xd2   :  { %v155_v63 = vpop.f32.mrf.mxu0  ;;  %v338_v55 = vmul.f32 %v1486_v34, %v1458_v20  ;;  %v479_v20 = vmul.f32 %v1491_v37, %v1460_v21 }
  0xd3   :  { %v156_v4 = vadd.f32 %v155_v63, %v1483_v32  ;;  %v506_v7 = vadd.f32 %v474_v60, %v365_v62  ;;  %v537_v14 = vmax.f32 %v505_v61, 0.0  ;;  %v366_v29 = vadd.f32 %v334_v10, %v154_v2 }
  0xd4   :  { %v157_v12 = vpop.f32.mrf.mxu0  ;;  %v341_v61 = vmul.f32 %v1494_v38, %v267_v52  ;;  %v481_v62 = vmul.f32 %v1491_v37, %v1462_v24 }
  0xd5   :  { %v158_v15 = vadd.f32 %v157_v12, %v1480_v31  ;;  %v538_v16 = vmax.f32 %v506_v7, 0.0  ;;  %v367_v5 = vadd.f32 %v335_v11, %v156_v4  ;;  %v567_v44 = vpack.c.bf16 %v537_v14, %v535_v6 }
  0xd6   :  { %v159_v18 = vpop.f32.mrf.mxu0  ;;  %v507_v47 = vadd.f32 %v475_v22, %v366_v29  ;;  %v482_v11 = vmul.f32 %v1500_v43, %v1462_v24  ;;  %v344_v24 = vmul.f32 %v1486_v34, %v1464_v26 }
  0xd7   :  { %v368_v30 = vadd.f32 %v336_v8, %v158_v15  ;;  %v160_v33 = vadd.f32 %v159_v18, %v1483_v32  ;;  %v568_v39 = vpack.c.bf16 %v538_v16, %v536_v25  ;;  %v508_v45 = vadd.f32 %v476_v23, %v367_v5  ;;  %v1543_v8 = vpop.permute.xlu1 %296 }
  0xd8   :  { %v163_v35 = vpop.f32.mrf.mxu0  ;;  %v539_v2 = vmax.f32 %v507_v47, 0.0 }
  0xd9   :  { %v509_v41 = vadd.f32 %v477_v13, %v368_v30  ;;  %v369_v42 = vadd.f32 %v337_v9, %v160_v33  ;;  %819 = vmatprep.mubr.bf16.mxu1 %v568_v39  ;;  %v164_v49 = vadd.f32 %v163_v35, %v1480_v31  ;;  %v540_v63 = vmax.f32 %v508_v45, 0.0  ;;  %v272_v13 = vpop.permute.xlu0 %271 }
  0xda   :  { %v165_v46 = vpop.f32.mrf.mxu0  ;;  %820 = vmatmul.mubr.bf16.vlgmr.msra.gmra.mxu1 %v567_v44  ;;  %v480_v9 = vmul.f32 %v1500_v43, %v1460_v21  ;;  %v342_v22 = vmul.f32 %v1486_v34, %v272_v13  ;;  %v343_v23 = vmul.f32 %v1494_v38, %v272_v13 }
  0xdb   :  { %v510_v48 = vadd.f32 %v478_v40, %v369_v42  ;;  %v166_v50 = vadd.f32 %v165_v46, %v1483_v32  ;;  %v541_v57 = vmax.f32 %v509_v41, 0.0  ;;  %v370_v3 = vadd.f32 %v338_v55, %v164_v49  ;;  %v1558_v39 = vpop.permute.xlu1 %441 }
  0xdc   :  { %v167_v54 = vpop.f32.mrf.mxu0  ;;  %v345_v40 = vmul.f32 %v1494_v38, %v1464_v26  ;;  %v485_v41 = vmul.f32 %v1491_v37, %v1488_v36  ;;  %v486_v26 = vmul.f32 %v1500_v43, %v1488_v36 }
  0xdd   :  { %v542_v58 = vmax.f32 %v510_v48, 0.0  ;;  %v168_v60 = vadd.f32 %v167_v54, %v1480_v31  ;;  %v371_v0 = vadd.f32 %v339_v53, %v166_v50  ;;  %v569_v15 = vpack.c.bf16 %v541_v57, %v539_v2  ;;  %v287_v48 = vpop.permute.xlu0 %286 }
  0xde   :  { %v169_v1 = vpop.f32.mrf.mxu0  ;;  %v511_v18 = vadd.f32 %v479_v20, %v370_v3  ;;  %v483_v53 = vmul.f32 %v1491_v37, %v422_v59  ;;  %v348_v36 = vmul.f32 %v1486_v34, %v287_v48 }
  0xdf   :  { %v372_v4 = vadd.f32 %v340_v19, %v168_v60  ;;  %v170_v7 = vadd.f32 %v169_v1, %v1483_v32  ;;  %v570_v10 = vpack.c.bf16 %v542_v58, %v540_v63  ;;  %v512_v16 = vadd.f32 %v480_v9, %v371_v0  ;;  %v1571_v3 = vpop.permute.xlu1 %301 }
  0xe0   :  { %v173_v52 = vpop.f32.mrf.mxu0  ;;  %v543_v46 = vmax.f32 %v511_v18, 0.0  ;;  %v484_v19 = vmul.f32 %v1500_v43, %v422_v59  ;;  %v347_v59 = vmul.f32 %v1494_v38, %v1508_v56  ;;  %v488_v18 = vmul.f32 %v1500_v43, %v1522_v17 }
  0xe1   :  { %v513_v12 = vadd.f32 %v481_v62, %v372_v4  ;;  %v373_v14 = vadd.f32 %v341_v61, %v170_v7  ;;  %829 = vmatprep.mubr.bf16.mxu1 %v570_v10  ;;  %v174_v21 = vadd.f32 %v173_v52, %v1480_v31  ;;  %v544_v42 = vmax.f32 %v512_v16, 0.0  ;;  %v292_v9 = vpop.permute.xlu0 %291 }
  0xe2   :  { %v175_v5 = vpop.f32.mrf.mxu0  ;;  %830 = vmatmul.mubr.bf16.gmra.mxu1 %v569_v15  ;;  %v346_v7 = vmul.f32 %v1486_v34, %v1508_v56  ;;  %v487_v56 = vmul.f32 %v1491_v37, %v1522_v17  ;;  %v350_v17 = vmul.f32 %v1486_v34, %v292_v9 }
  0xe3   :  { %v514_v25 = vadd.f32 %v482_v11, %v373_v14  ;;  %v176_v6 = vadd.f32 %v175_v5, %v1483_v32  ;;  %v545_v30 = vmax.f32 %v513_v12, 0.0  ;;  %v374_v47 = vadd.f32 %v342_v22, %v174_v21 }
  0xe4   :  { %v177_v29 = vpop.f32.mrf.mxu0  ;;  %v489_v11 = vmul.f32 %v1491_v37, %v1531_v51  ;;  %v349_v12 = vmul.f32 %v1494_v38, %v287_v48 }
  0xe5   :  { %v546_v33 = vmax.f32 %v514_v25, 0.0  ;;  %v178_v35 = vadd.f32 %v177_v29, %v1480_v31  ;;  %v375_v44 = vadd.f32 %v343_v23, %v176_v6  ;;  %v571_v60 = vpack.c.bf16 %v545_v30, %v543_v46  ;;  %v438_v30 = vpop.permute.xlu0 %437 }
  0xe6   :  { %v179_v45 = vpop.f32.mrf.mxu0  ;;  %v515_v63 = vadd.f32 %v483_v53, %v374_v47  ;;  %v490_v6 = vmul.f32 %v1500_v43, %v1531_v51  ;;  %v351_v47 = vmul.f32 %v1494_v38, %v292_v9  ;;  %v491_v51 = vmul.f32 %v1491_v37, %v438_v30 }
  0xe7   :  { %v376_v49 = vadd.f32 %v344_v24, %v178_v35  ;;  %v180_v50 = vadd.f32 %v179_v45, %v1483_v32  ;;  %v572_v55 = vpack.c.bf16 %v546_v33, %v544_v42  ;;  %v516_v61 = vadd.f32 %v484_v19, %v375_v44  ;;  %v446_v35 = vpop.permute.xlu1 %445 }
  0xe8   :  { %v183_v54 = vpop.f32.mrf.mxu0  ;;  %v547_v16 = vmax.f32 %v515_v63, 0.0  ;;  %v492_v48 = vmul.f32 %v1500_v43, %v438_v30 }
  0xe9   :  { %v517_v57 = vadd.f32 %v485_v41, %v376_v49  ;;  %v377_v58 = vadd.f32 %v345_v40, %v180_v50  ;;  %839 = vmatprep.mubr.bf16.mxu1 %v572_v55  ;;  %v184_v1 = vadd.f32 %v183_v54, %v1480_v31  ;;  %v548_v13 = vmax.f32 %v516_v61, 0.0 }
  0xea   :  { %v185_v62 = vpop.f32.mrf.mxu0  ;;  %840 = vmatmul.mubr.bf16.gmra.mxu1 %v571_v60  ;;  %v352_v50 = vmul.f32 %v1486_v34, %v1543_v8  ;;  %v353_v55 = vmul.f32 %v1494_v38, %v1543_v8 }
  0xeb   :  { %v518_v0 = vadd.f32 %v486_v26, %v377_v58  ;;  %v186_v2 = vadd.f32 %v185_v62, %v1483_v32  ;;  %v549_v20 = vmax.f32 %v517_v57, 0.0  ;;  %v378_v22 = vadd.f32 %v346_v7, %v184_v1  ;;  %v450_v1 = vpop.permute.xlu1 %449 }
  0xec   :  { %v187_v4 = vpop.f32.mrf.mxu0  ;;  %v493_v57 = vmul.f32 %v1491_v37, %v1558_v39 }
  0xed   :  { %v550_v52 = vmax.f32 %v518_v0, 0.0  ;;  %v188_v10 = vadd.f32 %v187_v4, %v1480_v31  ;;  %v379_v14 = vadd.f32 %v347_v59, %v186_v2  ;;  %v573_v33 = vpack.c.bf16 %v549_v20, %v547_v16  ;;  %v307_v2 = vpop.permute.xlu0 %306 }
  0xee   :  { %v189_v15 = vpop.f32.mrf.mxu0  ;;  %v519_v42 = vadd.f32 %v487_v56, %v378_v22  ;;  %v494_v4 = vmul.f32 %v1500_v43, %v1558_v39  ;;  %v355_v16 = vmul.f32 %v1494_v38, %v1571_v3  ;;  %v357_v39 = vmul.f32 %v1494_v38, %v307_v2 }
  0xef   :  { %v380_v23 = vadd.f32 %v348_v36, %v188_v10  ;;  %v190_v5 = vadd.f32 %v189_v15, %v1483_v32  ;;  %v574_v21 = vpack.c.bf16 %v550_v52, %v548_v13  ;;  %v520_v40 = vadd.f32 %v488_v18, %v379_v14  ;;  %v317_v15 = vpop.permute.xlu1 %316 }
  0xf0   :  { %v193_v25 = vpop.f32.mrf.mxu0  ;;  %v551_v61 = vmax.f32 %v519_v42, 0.0  ;;  %v356_v52 = vmul.f32 %v1486_v34, %v307_v2 }
  0xf1   :  { %v521_v29 = vadd.f32 %v489_v11, %v380_v23  ;;  %v381_v24 = vadd.f32 %v349_v12, %v190_v5  ;;  %849 = vmatprep.mubr.bf16.mxu1 %v574_v21  ;;  %v194_v45 = vadd.f32 %v193_v25, %v1480_v31  ;;  %v552_v26 = vmax.f32 %v520_v40, 0.0  ;;  %v312_v25 = vpop.permute.xlu0 %311 }
  0xf2   :  { %v195_v41 = vpop.f32.mrf.mxu0  ;;  %850 = vmatmul.mubr.bf16.gmra.mxu1 %v573_v33  ;;  %v354_v23 = vmul.f32 %v1486_v34, %v1571_v3 }
  0xf3   :  { %v522_v44 = vadd.f32 %v490_v6, %v381_v24  ;;  %v196_v46 = vadd.f32 %v195_v41, %v1483_v32  ;;  %v553_v53 = vmax.f32 %v521_v29, 0.0  ;;  %v382_v62 = vadd.f32 %v350_v17, %v194_v45 }
  0xf4   :  { %v197_v49 = vpop.f32.mrf.mxu0  ;;  %v495_v6 = vmul.f32 %v1491_v37, %v446_v35  ;;  %v497_v29 = vmul.f32 %v1491_v37, %v450_v1 }
  0xf5   :  { %v554_v19 = vmax.f32 %v522_v44, 0.0  ;;  %v198_v54 = vadd.f32 %v197_v49, %v1480_v31  ;;  %v383_v58 = vadd.f32 %v351_v47, %v196_v46  ;;  %v575_v20 = vpack.c.bf16 %v553_v53, %v551_v61 }
  0xf6   :  { %v199_v60 = vpop.f32.mrf.mxu0  ;;  %v523_v11 = vadd.f32 %v491_v51, %v382_v62  ;;  %v496_v44 = vmul.f32 %v1500_v43, %v446_v35  ;;  %v498_v46 = vmul.f32 %v1500_v43, %v450_v1  ;;  %v360_v53 = vmul.f32 %v1486_v34, %v317_v15  ;;  %v454_v35 = vpop.permute.xlu0 %453 }
  0xf7   :  { %v384_v63 = vadd.f32 %v352_v50, %v198_v54  ;;  %v200_v0 = vadd.f32 %v199_v60, %v1483_v32  ;;  %v576_v36 = vpack.c.bf16 %v554_v19, %v552_v26  ;;  %v524_v9 = vadd.f32 %v492_v48, %v383_v58  ;;  %v458_v48 = vpop.permute.xlu1 %457 }
  0xf8   :  { %v203_v59 = vpop.f32.mrf.mxu0  ;;  %v555_v33 = vmax.f32 %v523_v11, 0.0  ;;  %v359_v50 = vmul.f32 %v1494_v38, %v312_v25  ;;  %v358_v58 = vmul.f32 %v1486_v34, %v312_v25  ;;  %v500_v60 = vmul.f32 %v1500_v43, %v454_v35 }
  0xf9   :  { %v525_v7 = vadd.f32 %v493_v57, %v384_v63  ;;  %v385_v8 = vadd.f32 %v353_v55, %v200_v0  ;;  %859 = vmatprep.mubr.bf16.mxu1 %v576_v36  ;;  %v204_v13 = vadd.f32 %v203_v59, %v1480_v31  ;;  %v556_v21 = vmax.f32 %v524_v9, 0.0 }
  0xfa   :  { %v205_v10 = vpop.f32.mrf.mxu0  ;;  %860 = vmatmul.mubr.bf16.gmra.mxu1 %v575_v20  ;;  %v501_v62 = vmul.f32 %v1491_v37, %v458_v48  ;;  %v361_v36 = vmul.f32 %v1494_v38, %v317_v15 }
  0xfb   :  { %v526_v12 = vadd.f32 %v494_v4, %v385_v8  ;;  %v206_v14 = vadd.f32 %v205_v10, %v1483_v32  ;;  %v557_v5 = vmax.f32 %v525_v7, 0.0  ;;  %v386_v40 = vadd.f32 %v354_v23, %v204_v13 }
  0xfc   :  { %v207_v22 = vpop.f32.mrf.mxu0  ;;  %v499_v4 = vmul.f32 %v1491_v37, %v454_v35  ;;  %v502_v7 = vmul.f32 %v1500_v43, %v458_v48 }
  0xfd   :  { %v558_v56 = vmax.f32 %v526_v12, 0.0  ;;  %v208_v18 = vadd.f32 %v207_v22, %v1480_v31  ;;  %v387_v24 = vadd.f32 %v355_v16, %v206_v14  ;;  %v577_v51 = vpack.c.bf16 %v557_v5, %v555_v33 }
  0xfe   :  { %v209_v30 = vpop.f32.mrf.mxu0  ;;  %v527_v54 = vadd.f32 %v495_v6, %v386_v40 }
  0xff   :  { %v388_v41 = vadd.f32 %v356_v52, %v208_v18  ;;  %v210_v42 = vadd.f32 %v209_v30, %v1483_v32  ;;  %v578_v45 = vpack.c.bf16 %v558_v56, %v556_v21  ;;  %v528_v49 = vadd.f32 %v496_v44, %v387_v24 }
 0x100   :  { %v213_v3 = vpop.f32.mrf.mxu0  ;;  %v559_v20 = vmax.f32 %v527_v54, 0.0 }
 0x101   :  { %v529_v17 = vadd.f32 %v497_v29, %v388_v41  ;;  %v389_v47 = vadd.f32 %v357_v39, %v210_v42  ;;  %869 = vmatprep.mubr.bf16.mxu1 %v578_v45  ;;  %v214_v26 = vadd.f32 %v213_v3, %v1480_v31  ;;  %v560_v59 = vmax.f32 %v528_v49, 0.0 }
 0x102   :  { %v215_v19 = vpop.f32.mrf.mxu0  ;;  %870 = vmatmul.mubr.bf16.gmra.mxu1 %v577_v51 }
 0x103   :  { %v530_v55 = vadd.f32 %v498_v46, %v389_v47  ;;  %v216_v57 = vadd.f32 %v215_v19, %v1483_v32  ;;  %v561_v63 = vmax.f32 %v529_v17, 0.0  ;;  %v390_v34 = vadd.f32 %v358_v58, %v214_v26 }
 0x104   :  { %v217_v61 = vpop.f32.mrf.mxu0 }
 0x105   :  { %v562_v0 = vmax.f32 %v530_v55, 0.0  ;;  %v391_v1 = vadd.f32 %v359_v50, %v216_v57  ;;  %v218_v2 = vadd.f32 %v217_v61, %v1480_v31  ;;  %v579_v14 = vpack.c.bf16 %v561_v63, %v559_v20  ;;  %v615_v57 = vld [vmem:[%s1741_s6] sm:$0x3] }
 0x106   :  { %v219_v8 = vpop.f32.mrf.mxu0  ;;  %v531_v31 = vadd.f32 %v499_v4, %v390_v34 }
 0x107   :  { %v392_v9 = vadd.f32 %v360_v53, %v218_v2  ;;  %v220_v52 = vadd.f32 %v219_v8, %v1483_v32  ;;  %v580_v10 = vpack.c.bf16 %v562_v0, %v560_v59  ;;  %v532_v11 = vadd.f32 %v500_v60, %v391_v1  ;;  %v1634_v32 = vld [vmem:[%s1742_s7] sm:$0x3] }
 0x108   :  { %v563_v39 = vmax.f32 %v531_v31, 0.0  ;;  %v943_v5 = vrot.slane %v1634_v32, %v1471_v28  ;;  %v1674_v60 = vrot.slane %v615_v57, %v1469_v27 }
 0x109   :  { %v533_v12 = vadd.f32 %v501_v62, %v392_v9  ;;  %v393_v13 = vadd.f32 %v361_v36, %v220_v52  ;;  %879 = vmatprep.mubr.bf16.mxu1 %v580_v10  ;;  %v564_v38 = vmax.f32 %v532_v11, 0.0  ;;  %v1677_v62 = vrot.slane %v615_v57, %v1471_v28 }
 0x10a   :  { %880 = vmatmul.mubr.bf16.gmra.mxu1 %v579_v14  ;;  %1010 = vmatprep.mubr.f32.mxu0 %v943_v5 }
 0x10b   :  { %v534_v16 = vadd.f32 %v502_v7, %v393_v13  ;;  %v565_v15 = vmax.f32 %v533_v12, 0.0 }
 0x10d   :  { %v566_v37 = vmax.f32 %v534_v16, 0.0  ;;  %v581_v22 = vpack.c.bf16 %v565_v15, %v563_v39 }
 0x10f   :  { %v582_v43 = vpack.c.bf16 %v566_v37, %v564_v38 }
 0x111   :  { %889 = vmatprep.mubr.bf16.mxu1 %v582_v43 }
 0x112   :  { %890 = vmatmul.mubr.bf16.gmra.mxu1 %v581_v22 }
 0x19a   :  { %v1636_v23 = vpop.f32.mrf.mxu1 }
 0x19c   :  { %v1640_v56 = vpop.f32.mrf.mxu1 }
 0x19e   :  { %v1642_v18 = vpop.f32.mrf.mxu1 }
 0x1a0   :  { %v1644_v25 = vpop.f32.mrf.mxu1 }
 0x1a2   :  { %v1646_v21 = vpop.f32.mrf.mxu1 }
 0x1a4   :  { %v1648_v6 = vpop.f32.mrf.mxu1 }
 0x1a6   :  { %v1650_v29 = vpop.f32.mrf.mxu1 }
 0x1a8   :  { %v1652_v24 = vpop.f32.mrf.mxu1 }
 0x1aa   :  { %v1654_v30 = vpop.f32.mrf.mxu1 }
 0x1ac   :  { %v1656_v33 = vpop.f32.mrf.mxu1 }
 0x1ae   :  { %v1658_v40 = vpop.f32.mrf.mxu1 }
 0x1b0   :  { %v1660_v41 = vpop.f32.mrf.mxu1 }
 0x1b2   :  { %v1662_v42 = vpop.f32.mrf.mxu1 }
 0x1b4   :  { %v1664_v44 = vpop.f32.mrf.mxu1 }
 0x1b6   :  { %v1666_v3 = vpop.f32.mrf.mxu1 }
 0x1b8   :  { %v1668_v45 = vpop.f32.mrf.mxu1 }
 0x1ba   :  { %v861_v46 = vpop.f32.mrf.mxu1 }
 0x1bc   :  { %v863_v17 = vpop.f32.mrf.mxu1 }
 0x1bd   :  { %v864_v5 = vadd.f32 %v863_v17, %v1677_v62 }
 0x1be   :  { %v865_v47 = vpop.f32.mrf.mxu1 }
 0x1bf   :  { %v866_v43 = vadd.f32 %v865_v47, %v1674_v60  ;;  %v854_v47 = vadd.f32 %v1664_v44, %v1677_v62  ;;  %v844_v44 = vadd.f32 %v1656_v33, %v1677_v62  ;;  %v834_v33 = vadd.f32 %v1648_v6, %v1677_v62 }
 0x1c0   :  { %v867_v51 = vpop.f32.mrf.mxu1  ;;  %v824_v6 = vadd.f32 %v1640_v56, %v1677_v62  ;;  %v934_v56 = vstv %s1743_s8 }
 0x1c1   :  { %v868_v37 = vadd.f32 %v867_v51, %v1677_v62  ;;  %v856_v51 = vadd.f32 %v1666_v3, %v1674_v60  ;;  %v846_v3 = vadd.f32 %v1658_v40, %v1674_v60  ;;  %v836_v40 = vadd.f32 %v1650_v29, %v1674_v60 }
 0x1c2   :  { %v871_v48 = vpop.f32.mrf.mxu1  ;;  %v826_v29 = vadd.f32 %v1642_v18, %v1674_v60 }
 0x1c3   :  { %v872_v38 = vadd.f32 %v871_v48, %v1674_v60  ;;  %v858_v48 = vadd.f32 %v1668_v45, %v1677_v62  ;;  %v848_v45 = vadd.f32 %v1660_v41, %v1677_v62  ;;  %v838_v41 = vadd.f32 %v1652_v24, %v1677_v62 }
 0x1c4   :  { %v873_v49 = vpop.f32.mrf.mxu1  ;;  %v828_v24 = vadd.f32 %v1644_v25, %v1677_v62 }
 0x1c5   :  { %v874_v31 = vadd.f32 %v873_v49, %v1677_v62  ;;  %v920_v22 = vmax.f32 %v872_v38, 0.0  ;;  %v862_v49 = vadd.f32 %v861_v46, %v1674_v60  ;;  %v915_v17 = vmax.f32 %v858_v48, 0.0 }
 0x1c6   :  { %v875_v50 = vpop.f32.mrf.mxu1  ;;  %v852_v46 = vadd.f32 %v1662_v42, %v1674_v60  ;;  %v911_v57 = vmax.f32 %v848_v45, 0.0  ;;  %v842_v42 = vadd.f32 %v1654_v30, %v1674_v60  ;;  %v832_v30 = vadd.f32 %v1646_v21, %v1674_v60 }
 0x1c7   :  { %v876_v13 = vadd.f32 %v875_v50, %v1674_v60  ;;  %v921_v39 = vmax.f32 %v874_v31, 0.0  ;;  %v919_v50 = vmax.f32 %v868_v37, 0.0  ;;  %v822_v21 = vadd.f32 %v1636_v23, %v1674_v60 }
 0x1c8   :  { %v877_v53 = vpop.f32.mrf.mxu1 }
 0x1c9   :  { %v878_v11 = vadd.f32 %v877_v53, %v1677_v62  ;;  %v922_v15 = vmax.f32 %v876_v13, 0.0  ;;  %v918_v53 = vmax.f32 %v866_v43, 0.0  ;;  %v900_v25 = vmax.f32 %v822_v21, 0.0 }
 0x1ca   :  { %v881_v19 = vpop.f32.mrf.mxu1 }
 0x1cb   :  { %v882_v52 = vadd.f32 %v881_v19, %v1674_v60  ;;  %v923_v16 = vmax.f32 %v878_v11, 0.0  ;;  %v917_v19 = vmax.f32 %v864_v5, 0.0 }
 0x1cc   :  { %v883_v54 = vpop.f32.mrf.mxu1 }
 0x1cd   :  { %v884_v34 = vadd.f32 %v883_v54, %v1677_v62  ;;  %v924_v14 = vmax.f32 %v882_v52, 0.0  ;;  %v916_v54 = vmax.f32 %v862_v49, 0.0 }
 0x1ce   :  { %v885_v55 = vpop.f32.mrf.mxu1 }
 0x1cf   :  { %v886_v28 = vadd.f32 %v885_v55, %v1674_v60  ;;  %v925_v12 = vmax.f32 %v884_v34, 0.0  ;;  %v914_v55 = vmax.f32 %v856_v51, 0.0 }
 0x1d0   :  { %v887_v26 = vpop.f32.mrf.mxu1 }
 0x1d1   :  { %v888_v7 = vadd.f32 %v887_v26, %v1677_v62  ;;  %v926_v10 = vmax.f32 %v886_v28, 0.0  ;;  %v913_v26 = vmax.f32 %v854_v47, 0.0 }
 0x1d2   :  { %v891_v35 = vpop.f32.mrf.mxu1 }
 0x1d3   :  { %v892_v36 = vadd.f32 %v891_v35, %v1674_v60  ;;  %v927_v9 = vmax.f32 %v888_v7, 0.0  ;;  %v912_v35 = vmax.f32 %v852_v46, 0.0  ;;  %v901_v7 = vmax.f32 %v824_v6, 0.0 }
 0x1d4   :  { %v893_v58 = vpop.f32.mrf.mxu1 }
 0x1d5   :  { %v894_v1 = vadd.f32 %v893_v58, %v1677_v62  ;;  %v928_v20 = vmax.f32 %v892_v36, 0.0  ;;  %v910_v58 = vmax.f32 %v846_v3, 0.0  ;;  %v903_v36 = vmax.f32 %v828_v24, 0.0 }
 0x1d6   :  { %v895_v61 = vpop.f32.mrf.mxu1 }
 0x1d7   :  { %v896_v63 = vadd.f32 %v895_v61, %v1674_v60  ;;  %v929_v8 = vmax.f32 %v894_v1, 0.0  ;;  %v909_v61 = vmax.f32 %v844_v44, 0.0  ;;  %v906_v1 = vmax.f32 %v836_v40, 0.0 }
 0x1d8   :  { %v897_v0 = vpop.f32.mrf.mxu1 }
 0x1d9   :  { %v898_v2 = vadd.f32 %v897_v0, %v1677_v62  ;;  %v930_v4 = vmax.f32 %v896_v63, 0.0  ;;  %v908_v63 = vmax.f32 %v842_v42, 0.0  ;;  %v907_v0 = vmax.f32 %v838_v41, 0.0 }
 0x1db   :  { %v931_v59 = vmax.f32 %v898_v2, 0.0  ;;  %v905_v2 = vmax.f32 %v834_v33, 0.0 }
 0x1dd   :  { %946 = vmatprep.subr.mxu0 %v931_v59  ;;  %v904_v59 = vmax.f32 %v832_v30, 0.0 }
 0x1de   :  { %947 = vmatpush1.xpose.msra.mxu0 %v930_v4  ;;  %v902_v4 = vmax.f32 %v826_v29, 0.0 }
 0x1df   :  { %948 = vmatprep.subr.mxu0 %v929_v8  ;;  %v939_v8 = vrot.slane %v1634_v32, %v1469_v27 }
 0x1e2   :  { %949 = vmatpush1.xpose.msra.mxu0 %v928_v20 }
 0x1e3   :  { %950 = vmatprep.subr.mxu0 %v927_v9 }
 0x1e6   :  { %951 = vmatpush1.xpose.msra.mxu0 %v926_v10 }
 0x1e7   :  { %952 = vmatprep.subr.mxu0 %v925_v12 }
 0x1ea   :  { %953 = vmatpush1.xpose.msra.mxu0 %v924_v14 }
 0x1eb   :  { %954 = vmatprep.subr.mxu0 %v923_v16 }
 0x1ee   :  { %955 = vmatpush1.xpose.msra.mxu0 %v922_v15 }
 0x1ef   :  { %956 = vmatprep.subr.mxu0 %v921_v39 }
 0x1f2   :  { %957 = vmatpush1.xpose.msra.mxu0 %v920_v22 }
 0x1f3   :  { %958 = vmatprep.subr.mxu0 %v919_v50 }
 0x1f6   :  { %959 = vmatpush1.xpose.msra.mxu0 %v918_v53 }
 0x1f7   :  { %960 = vmatprep.subr.mxu0 %v917_v19 }
 0x1fa   :  { %961 = vmatpush1.xpose.msra.mxu0 %v916_v54 }
 0x1fb   :  { %962 = vmatprep.subr.mxu0 %v915_v17 }
 0x1fe   :  { %963 = vmatpush1.xpose.msra.mxu0 %v914_v55 }
 0x1ff   :  { %964 = vmatprep.subr.mxu0 %v913_v26 }
 0x202   :  { %965 = vmatpush1.xpose.msra.mxu0 %v912_v35 }
 0x203   :  { %966 = vmatprep.subr.mxu0 %v911_v57 }
 0x206   :  { %967 = vmatpush1.xpose.msra.mxu0 %v910_v58 }
 0x207   :  { %968 = vmatprep.subr.mxu0 %v909_v61 }
 0x20a   :  { %969 = vmatpush1.xpose.msra.mxu0 %v908_v63 }
 0x20b   :  { %970 = vmatprep.subr.mxu0 %v907_v0 }
 0x20e   :  { %971 = vmatpush1.xpose.msra.mxu0 %v906_v1 }
 0x20f   :  { %972 = vmatprep.subr.mxu0 %v905_v2 }
 0x212   :  { %973 = vmatpush1.xpose.msra.mxu0 %v904_v59 }
 0x213   :  { %974 = vmatprep.subr.mxu0 %v903_v36 }
 0x216   :  { %975 = vmatpush1.xpose.msra.mxu0 %v902_v4 }
 0x217   :  { %976 = vmatprep.subr.mxu0 %v901_v7 }
 0x21a   :  { %977 = vmatpush1.xpose.msra.mxu0 %v900_v25 }
 0x21d   :  { %1011 = vmatmul.mubr.f32.vlgmr.msra.gmra.mxu0 %v939_v8 }
 0x2dd   :  { %v1012_v18 = vpop.f32.mrf.mxu0 }
 0x2de   :  { %v1013_v62 = vadd.f32 %v1012_v18, %v934_v56 }
 0x2df   :  { %v1014_v23 = vpop.f32.mrf.mxu0 }
 0x2e0   :  { %1016 = vst [vmem:[#allocation3] sm:$0x1] %v1013_v62 }
 0x2e1   :  { %1160 = shalt.err (!%p1157_p4)
}
 0x2e2   :  { %1026 = dma.vmem_to_hbm [thread:$0]  %s1024_s12, 16, %s1744_s9, [#allocation4]  }
 0x2e3   :  { %1169 = dma.done.wait [#allocation4], 16  }
 0x2e4   :  { %1170 = vsyncadd [#allocation4], 4294967280 }
 0x2e5   :  { %1030 = vsyncpa [#allocation4], 1 }

</bundles_post_ra>
